<compile_context>
chip_gen: v7x
topology: tpu7x:2x2x1
jax: 0.10.0
libtpu: 0.0.40
codegen_flags: <defaults>
</compile_context>

<pallas_src>
import functools
import math

import jax
import jax.numpy as jnp
from jax.experimental import pallas as pl
from jax.experimental.pallas import tpu as pltpu


def _mhsa_kernel(x_ref, wq_ref, wk_ref, wv_ref, wo_ref,
                 bq_ref, bk_ref, bv_ref, bo_ref,
                 out_ref, *attnw_refs, num_heads):
    # x_ref block: (1, L, E) bf16 — one batch element per grid step.
    x = x_ref[0]                                            # (L, E) bf16
    L, E = x.shape
    H = num_heads
    hd = E // H
    scale = 1.0 / math.sqrt(hd)

    # QKV projections: bf16 operands on the MXU, f32 accumulation, f32 bias add.
    q = jnp.dot(x, wq_ref[...], preferred_element_type=jnp.float32) + bq_ref[...]
    k = jnp.dot(x, wk_ref[...], preferred_element_type=jnp.float32) + bk_ref[...]
    v = jnp.dot(x, wv_ref[...], preferred_element_type=jnp.float32) + bv_ref[...]

    # (L, E) -> (H, L, hd) once; bf16 operands for the batched MXU matmuls.
    def heads(t):
        return jnp.swapaxes(t.reshape(L, H, hd), 0, 1).astype(jnp.bfloat16)

    qh, kh, vh = heads(q), heads(k), heads(v)

    # Scores: contraction over the shared hd axis — no explicit kh.T relayout.
    s = jnp.einsum('hld,hmd->hlm', qh, kh,
                   preferred_element_type=jnp.float32) * scale      # (H, L, L) f32

    # Softmax in f32; denominator via EUP reciprocal instead of a VALU divide.
    s = s - jnp.max(s, axis=-1, keepdims=True)
    p = jnp.exp(s)
    p = p * pl.reciprocal(jnp.sum(p, axis=-1, keepdims=True), approx=True)

    if attnw_refs:   # static (trace-time) flag: only write weights if requested
        attnw_ref, = attnw_refs
        attnw_ref[0] = (jnp.sum(p, axis=0) * (1.0 / H)).astype(attnw_ref.dtype)

    # Context (batched, bf16 operands) + output projection.
    ctx = jnp.einsum('hlm,hmd->hld', p.astype(jnp.bfloat16), vh,
                     preferred_element_type=jnp.float32)            # (H, L, hd) f32
    ctx = jnp.swapaxes(ctx, 0, 1).reshape(L, E).astype(jnp.bfloat16)
    y = jnp.dot(ctx, wo_ref[...], preferred_element_type=jnp.float32) + bo_ref[...]
    out_ref[0] = y.astype(out_ref.dtype)


def multihead_self_attention(x_lne, in_proj_w, in_proj_b, out_w, out_b, num_heads,
                             *, need_weights=True):
    """x_lne: (L, N, E) — PyTorch nn.MultiheadAttention default layout."""
    L, N, E = x_lne.shape
    assert E % num_heads == 0

    # Batch-major for the kernel; bf16 activations for the MXU (halves HBM traffic).
    # TODO(synk): at production scale keep the whole model batch-major (or index the
    # (L, N, E) array directly from the BlockSpec) to avoid this XLA-level transpose.
    x = jnp.transpose(x_lne, (1, 0, 2)).astype(jnp.bfloat16)        # (N, L, E)

    # Split the packed in-proj, pre-transpose so the kernel does x @ W (W = Wq^T),
    # and cast weights to bf16 once outside the kernel (halves their VMEM footprint).
    wq_t = in_proj_w[0 * E:1 * E].T.astype(jnp.bfloat16)            # (E, E)
    wk_t = in_proj_w[1 * E:2 * E].T.astype(jnp.bfloat16)
    wv_t = in_proj_w[2 * E:3 * E].T.astype(jnp.bfloat16)
    wo_t = out_w.T.astype(jnp.bfloat16)
    bq = in_proj_b[0 * E:1 * E].reshape(1, E).astype(jnp.float32)
    bk = in_proj_b[1 * E:2 * E].reshape(1, E).astype(jnp.float32)
    bv = in_proj_b[2 * E:3 * E].reshape(1, E).astype(jnp.float32)
    bo = out_b.reshape(1, E).astype(jnp.float32)

    const2 = lambda b: (0, 0)   # grid-invariant operands: DMA'd once, never re-fetched
    in_specs = [
        pl.BlockSpec((1, L, E), lambda b: (b, 0, 0)),   # x
        pl.BlockSpec((E, E), const2),                   # Wq^T
        pl.BlockSpec((E, E), const2),                   # Wk^T
        pl.BlockSpec((E, E), const2),                   # Wv^T
        pl.BlockSpec((E, E), const2),                   # Wo^T
        pl.BlockSpec((1, E), const2),                   # bq
        pl.BlockSpec((1, E), const2),                   # bk
        pl.BlockSpec((1, E), const2),                   # bv
        pl.BlockSpec((1, E), const2),                   # bo
    ]
    out_shape = [jax.ShapeDtypeStruct((N, L, E), jnp.float32)]
    out_specs = [pl.BlockSpec((1, L, E), lambda b: (b, 0, 0))]
    if need_weights:
        out_shape.append(jax.ShapeDtypeStruct((N, L, L), jnp.float32))
        out_specs.append(pl.BlockSpec((1, L, L), lambda b: (b, 0, 0)))

    kernel = functools.partial(_mhsa_kernel, num_heads=num_heads)
    results = pl.pallas_call(
        kernel,
        out_shape=tuple(out_shape),
        grid_spec=pltpu.PrefetchScalarGridSpec(
            num_scalar_prefetch=0,
            grid=(N,),
            in_specs=in_specs,
            out_specs=tuple(out_specs),
        ),
        compiler_params=pltpu.CompilerParams(
            dimension_semantics=("parallel",),
            # Explicit scoped-VMEM budget (re-derive for v7x's 64 MiB physical VMEM).
            vmem_limit_bytes=32 * 1024 * 1024,
        ),
    )(x, wq_t, wk_t, wv_t, wo_t, bq, bk, bv, bo)

    if need_weights:
        out, attnw = results
    else:
        out, attnw = results[0], None

    attn_output = jnp.transpose(out, (1, 0, 2))                      # back to (L, N, E)
    return attn_output, attnw


def _reference_mha(x_lne, in_proj_w, in_proj_b, out_w, out_b, num_heads):
    """Plain-JAX (f32) replica of torch.nn.MultiheadAttention forward (no mask, no dropout)."""
    L, N, E = x_lne.shape
    hd = E // num_heads
    qkv = jnp.einsum('lne,fe->lnf', x_lne, in_proj_w) + in_proj_b
    q, k, v = jnp.split(qkv, 3, axis=-1)

    def split_heads(t):
        return t.reshape(L, N, num_heads, hd).transpose(1, 2, 0, 3)   # (N,H,L,hd)

    qh, kh, vh = map(split_heads, (q, k, v))
    s = jnp.einsum('nhld,nhmd->nhlm', qh, kh) / math.sqrt(hd)
    p = jax.nn.softmax(s, axis=-1)
    o = jnp.einsum('nhlm,nhmd->nhld', p, vh)
    o = o.transpose(2, 0, 1, 3).reshape(L, N, E)
    y = jnp.einsum('lne,fe->lnf', o, out_w) + out_b
    return y, p.mean(axis=1)


if __name__ == "__main__":
    L, N, E, H = 8, 2, 32, 4     # seq, batch, embed_dim, num_heads

    key = jax.random.PRNGKey(0)
    kx, kw1, kw2, kb1, kb2 = jax.random.split(key, 5)

    # Deterministic parameter init (shapes match nn.MultiheadAttention(E, H)).
    bound_in = math.sqrt(6.0 / (E + 3 * E))               # xavier-uniform-ish
    in_proj_w = jax.random.uniform(kw1, (3 * E, E), jnp.float32, -bound_in, bound_in)
    in_proj_b = 0.1 * jax.random.normal(kb1, (3 * E,), jnp.float32)
    bound_out = 1.0 / math.sqrt(E)
    out_w = jax.random.uniform(kw2, (E, E), jnp.float32, -bound_out, bound_out)
    out_b = 0.1 * jax.random.normal(kb2, (E,), jnp.float32)

    x = jax.random.normal(kx, (L, N, E), jnp.float32)     # (L, N, E) PyTorch layout

    attn_out, attn_w = multihead_self_attention(x, in_proj_w, in_proj_b, out_w, out_b, H)
    jax.block_until_ready((attn_out, attn_w))

    ref_out, ref_w = _reference_mha(x, in_proj_w, in_proj_b, out_w, out_b, H)
    assert attn_out.shape == (L, N, E) and attn_w.shape == (N, L, L)
    # bf16 MXU operands + approx reciprocal -> relaxed tolerance vs the f32 reference.
    assert jnp.allclose(attn_out, ref_out, rtol=2e-2, atol=2e-2)
    assert jnp.allclose(attn_w, ref_w, rtol=2e-2, atol=2e-2)

    # need_weights=False path: skips the O(L^2) attn-weights HBM writeback entirely.
    fast_out, no_w = multihead_self_attention(
        x, in_proj_w, in_proj_b, out_w, out_b, H, need_weights=False)
    jax.block_until_ready(fast_out)
    assert no_w is None
    assert jnp.allclose(fast_out, ref_out, rtol=2e-2, atol=2e-2)

    print("KERNEL_OK")
</pallas_src>

<mosaic_0001>
module attributes {stable_mosaic.version = 11 : i64} {
  func.func @_mhsa_kernel(%arg0: i32, %arg1: memref<1x8x32xbf16, #tpu.memory_space<vmem>>, %arg2: memref<32x32xbf16, #tpu.memory_space<vmem>>, %arg3: memref<32x32xbf16, #tpu.memory_space<vmem>>, %arg4: memref<32x32xbf16, #tpu.memory_space<vmem>>, %arg5: memref<32x32xbf16, #tpu.memory_space<vmem>>, %arg6: memref<1x32xf32, #tpu.memory_space<vmem>>, %arg7: memref<1x32xf32, #tpu.memory_space<vmem>>, %arg8: memref<1x32xf32, #tpu.memory_space<vmem>>, %arg9: memref<1x32xf32, #tpu.memory_space<vmem>>, %arg10: memref<1x8x32xf32, #tpu.memory_space<vmem>>, %arg11: memref<1x8x8xf32, #tpu.memory_space<vmem>>) attributes {dimension_semantics = [#tpu.dimension_semantics<parallel>], iteration_bounds = array<i64: 2>, scalar_prefetch = 0 : i64, scratch_operands = 0 : i64, tpu.core_type = #tpu.core_type<tc>, window_params = [{transform_indices = @transform_0, window_bounds = array<i64: 1, 8, 32>}, {pipeline_mode = #tpu.pipeline_mode<synchronous>, transform_indices = @transform_1, window_bounds = array<i64: 32, 32>}, {pipeline_mode = #tpu.pipeline_mode<synchronous>, transform_indices = @transform_2, window_bounds = array<i64: 32, 32>}, {pipeline_mode = #tpu.pipeline_mode<synchronous>, transform_indices = @transform_3, window_bounds = array<i64: 32, 32>}, {pipeline_mode = #tpu.pipeline_mode<synchronous>, transform_indices = @transform_4, window_bounds = array<i64: 32, 32>}, {pipeline_mode = #tpu.pipeline_mode<synchronous>, transform_indices = @transform_5, window_bounds = array<i64: 1, 32>}, {pipeline_mode = #tpu.pipeline_mode<synchronous>, transform_indices = @transform_6, window_bounds = array<i64: 1, 32>}, {pipeline_mode = #tpu.pipeline_mode<synchronous>, transform_indices = @transform_7, window_bounds = array<i64: 1, 32>}, {pipeline_mode = #tpu.pipeline_mode<synchronous>, transform_indices = @transform_8, window_bounds = array<i64: 1, 32>}, {transform_indices = @transform_9, window_bounds = array<i64: 1, 8, 32>}, {transform_indices = @transform_10, window_bounds = array<i64: 1, 8, 8>}]} {
    %c0 = arith.constant 0 : index
    %c0_0 = arith.constant 0 : index
    %c0_1 = arith.constant 0 : index
    %0 = vector.load %arg1[%c0, %c0_0, %c0_1] : memref<1x8x32xbf16, #tpu.memory_space<vmem>>, vector<1x8x32xbf16>
    %1 = vector.shape_cast %0 : vector<1x8x32xbf16> to vector<8x32xbf16>
    %c0_2 = arith.constant 0 : index
    %c0_3 = arith.constant 0 : index
    %2 = vector.load %arg2[%c0_2, %c0_3] : memref<32x32xbf16, #tpu.memory_space<vmem>>, vector<32x32xbf16>
    %cst = arith.constant dense<0.000000e+00> : vector<8x32xf32>
    %3 = tpu.matmul %1, %2, %cst {dimension_numbers = #tpu.dot_dimension_numbers<[1], [0], [0], [1], [0, 0, 1, 1], [], []>} : vector<8x32xbf16>, vector<32x32xbf16>, vector<8x32xf32> -> vector<8x32xf32>
    %c0_4 = arith.constant 0 : index
    %c0_5 = arith.constant 0 : index
    %4 = vector.load %arg6[%c0_4, %c0_5] : memref<1x32xf32, #tpu.memory_space<vmem>>, vector<1x32xf32>
    %5 = vector.broadcast %4 : vector<1x32xf32> to vector<8x32xf32>
    %6 = arith.addf %3, %5 : vector<8x32xf32>
    %c0_6 = arith.constant 0 : index
    %c0_7 = arith.constant 0 : index
    %7 = vector.load %arg3[%c0_6, %c0_7] : memref<32x32xbf16, #tpu.memory_space<vmem>>, vector<32x32xbf16>
    %cst_8 = arith.constant dense<0.000000e+00> : vector<8x32xf32>
    %8 = tpu.matmul %1, %7, %cst_8 {dimension_numbers = #tpu.dot_dimension_numbers<[1], [0], [0], [1], [0, 0, 1, 1], [], []>} : vector<8x32xbf16>, vector<32x32xbf16>, vector<8x32xf32> -> vector<8x32xf32>
    %c0_9 = arith.constant 0 : index
    %c0_10 = arith.constant 0 : index
    %9 = vector.load %arg7[%c0_9, %c0_10] : memref<1x32xf32, #tpu.memory_space<vmem>>, vector<1x32xf32>
    %10 = vector.broadcast %9 : vector<1x32xf32> to vector<8x32xf32>
    %11 = arith.addf %8, %10 : vector<8x32xf32>
    %c0_11 = arith.constant 0 : index
    %c0_12 = arith.constant 0 : index
    %12 = vector.load %arg4[%c0_11, %c0_12] : memref<32x32xbf16, #tpu.memory_space<vmem>>, vector<32x32xbf16>
    %cst_13 = arith.constant dense<0.000000e+00> : vector<8x32xf32>
    %13 = tpu.matmul %1, %12, %cst_13 {dimension_numbers = #tpu.dot_dimension_numbers<[1], [0], [0], [1], [0, 0, 1, 1], [], []>} : vector<8x32xbf16>, vector<32x32xbf16>, vector<8x32xf32> -> vector<8x32xf32>
    %c0_14 = arith.constant 0 : index
    %c0_15 = arith.constant 0 : index
    %14 = vector.load %arg8[%c0_14, %c0_15] : memref<1x32xf32, #tpu.memory_space<vmem>>, vector<1x32xf32>
    %15 = vector.broadcast %14 : vector<1x32xf32> to vector<8x32xf32>
    %16 = arith.addf %13, %15 : vector<8x32xf32>
    %17 = vector.shape_cast %6 : vector<8x32xf32> to vector<8x4x8xf32>
    %18 = tpu.transpose %17, [1, 0, 2] : vector<8x4x8xf32> -> vector<4x8x8xf32>
    %19 = arith.truncf %18 : vector<4x8x8xf32> to vector<4x8x8xbf16>
    %20 = vector.shape_cast %11 : vector<8x32xf32> to vector<8x4x8xf32>
    %21 = tpu.transpose %20, [1, 0, 2] : vector<8x4x8xf32> -> vector<4x8x8xf32>
    %22 = arith.truncf %21 : vector<4x8x8xf32> to vector<4x8x8xbf16>
    %23 = vector.shape_cast %16 : vector<8x32xf32> to vector<8x4x8xf32>
    %24 = tpu.transpose %23, [1, 0, 2] : vector<8x4x8xf32> -> vector<4x8x8xf32>
    %25 = arith.truncf %24 : vector<4x8x8xf32> to vector<4x8x8xbf16>
    "tpu.trace_start"() <{level = 10 : i32, message = "hld,hmd->hlm"}> : () -> ()
    %cst_16 = arith.constant dense<0.000000e+00> : vector<4x8x8xf32>
    %26 = tpu.matmul %19, %22, %cst_16 {dimension_numbers = #tpu.dot_dimension_numbers<[2], [2], [1], [1], [0, 0, 0, 1, 1, 1], [0], [0]>} : vector<4x8x8xbf16>, vector<4x8x8xbf16>, vector<4x8x8xf32> -> vector<4x8x8xf32>
    "tpu.trace_stop"() : () -> ()
    %cst_17 = arith.constant 0.353553385 : f32
    %27 = vector.broadcast %cst_17 : f32 to vector<4x8x8xf32>
    %28 = arith.mulf %26, %27 : vector<4x8x8xf32>
    %cst_18 = arith.constant dense<0xFF800000> : vector<4x8xf32>
    %29 = vector.multi_reduction <maximumf>, %28, %cst_18 [2] : vector<4x8x8xf32> to vector<4x8xf32>
    %30 = vector.shape_cast %29 : vector<4x8xf32> to vector<4x8x1xf32>
    %31 = vector.broadcast %30 : vector<4x8x1xf32> to vector<4x8x8xf32>
    %32 = arith.subf %28, %31 : vector<4x8x8xf32>
    %33 = math.exp %32 : vector<4x8x8xf32>
    %cst_19 = arith.constant dense<0.000000e+00> : vector<4x8xf32>
    %34 = vector.multi_reduction <add>, %33, %cst_19 [2] : vector<4x8x8xf32> to vector<4x8xf32>
    %35 = vector.shape_cast %34 : vector<4x8xf32> to vector<4x8x1xf32>
    %36 = tpu.reciprocal %35 {approx = true} : vector<4x8x1xf32> -> vector<4x8x1xf32>
    %37 = vector.broadcast %36 : vector<4x8x1xf32> to vector<4x8x8xf32>
    %38 = arith.mulf %33, %37 : vector<4x8x8xf32>
    %cst_20 = arith.constant dense<0.000000e+00> : vector<8x8xf32>
    %39 = vector.multi_reduction <add>, %38, %cst_20 [0] : vector<4x8x8xf32> to vector<8x8xf32>
    %cst_21 = arith.constant 2.500000e-01 : f32
    %40 = vector.broadcast %cst_21 : f32 to vector<8x8xf32>
    %41 = arith.mulf %39, %40 : vector<8x8xf32>
    %c0_22 = arith.constant 0 : index
    %c0_23 = arith.constant 0 : index
    %c0_24 = arith.constant 0 : index
    %42 = vector.load %arg11[%c0_22, %c0_23, %c0_24] : memref<1x8x8xf32, #tpu.memory_space<vmem>>, vector<1x8x8xf32>
    %43 = vector.shape_cast %42 : vector<1x8x8xf32> to vector<8x8xf32>
    %44 = vector.shape_cast %41 : vector<8x8xf32> to vector<1x8x8xf32>
    tpu.vector_store %arg11[%c0_22, %c0_23, %c0_24], %44 {strides = array<i32>} : memref<1x8x8xf32, #tpu.memory_space<vmem>>, vector<1x8x8xf32>,
    %45 = arith.truncf %38 : vector<4x8x8xf32> to vector<4x8x8xbf16>
    "tpu.trace_start"() <{level = 10 : i32, message = "hlm,hmd->hld"}> : () -> ()
    %cst_25 = arith.constant dense<0.000000e+00> : vector<4x8x8xf32>
    %46 = tpu.matmul %45, %25, %cst_25 {dimension_numbers = #tpu.dot_dimension_numbers<[2], [1], [1], [2], [0, 0, 0, 1, 1, 2], [0], [0]>} : vector<4x8x8xbf16>, vector<4x8x8xbf16>, vector<4x8x8xf32> -> vector<4x8x8xf32>
    "tpu.trace_stop"() : () -> ()
    %47 = tpu.transpose %46, [1, 0, 2] : vector<4x8x8xf32> -> vector<8x4x8xf32>
    %48 = vector.shape_cast %47 : vector<8x4x8xf32> to vector<8x32xf32>
    %49 = arith.truncf %48 : vector<8x32xf32> to vector<8x32xbf16>
    %c0_26 = arith.constant 0 : index
    %c0_27 = arith.constant 0 : index
    %50 = vector.load %arg5[%c0_26, %c0_27] : memref<32x32xbf16, #tpu.memory_space<vmem>>, vector<32x32xbf16>
    %cst_28 = arith.constant dense<0.000000e+00> : vector<8x32xf32>
    %51 = tpu.matmul %49, %50, %cst_28 {dimension_numbers = #tpu.dot_dimension_numbers<[1], [0], [0], [1], [0, 0, 1, 1], [], []>} : vector<8x32xbf16>, vector<32x32xbf16>, vector<8x32xf32> -> vector<8x32xf32>
    %c0_29 = arith.constant 0 : index
    %c0_30 = arith.constant 0 : index
    %52 = vector.load %arg9[%c0_29, %c0_30] : memref<1x32xf32, #tpu.memory_space<vmem>>, vector<1x32xf32>
    %53 = vector.broadcast %52 : vector<1x32xf32> to vector<8x32xf32>
    %54 = arith.addf %51, %53 : vector<8x32xf32>
    %c0_31 = arith.constant 0 : index
    %c0_32 = arith.constant 0 : index
    %c0_33 = arith.constant 0 : index
    %55 = vector.load %arg10[%c0_31, %c0_32, %c0_33] : memref<1x8x32xf32, #tpu.memory_space<vmem>>, vector<1x8x32xf32>
    %56 = vector.shape_cast %55 : vector<1x8x32xf32> to vector<8x32xf32>
    %57 = vector.shape_cast %54 : vector<8x32xf32> to vector<1x8x32xf32>
    tpu.vector_store %arg10[%c0_31, %c0_32, %c0_33], %57 {strides = array<i32>} : memref<1x8x32xf32, #tpu.memory_space<vmem>>, vector<1x8x32xf32>,
    return
  }
  func.func @transform_0(%arg0: i32) -> (i32, i32, i32) {
    %c0_i32 = arith.constant 0 : i32
    %c0_i32_0 = arith.constant 0 : i32
    %c0_i32_1 = arith.constant 0 : i32
    return %arg0, %c0_i32, %c0_i32_0 : i32, i32, i32
  }
  func.func @transform_1(%arg0: i32) -> (i32, i32) {
    %c0_i32 = arith.constant 0 : i32
    %c0_i32_0 = arith.constant 0 : i32
    %c0_i32_1 = arith.constant 0 : i32
    return %c0_i32, %c0_i32_0 : i32, i32
  }
  func.func @transform_2(%arg0: i32) -> (i32, i32) {
    %c0_i32 = arith.constant 0 : i32
    %c0_i32_0 = arith.constant 0 : i32
    %c0_i32_1 = arith.constant 0 : i32
    return %c0_i32, %c0_i32_0 : i32, i32
  }
  func.func @transform_3(%arg0: i32) -> (i32, i32) {
    %c0_i32 = arith.constant 0 : i32
    %c0_i32_0 = arith.constant 0 : i32
    %c0_i32_1 = arith.constant 0 : i32
    return %c0_i32, %c0_i32_0 : i32, i32
  }
  func.func @transform_4(%arg0: i32) -> (i32, i32) {
    %c0_i32 = arith.constant 0 : i32
    %c0_i32_0 = arith.constant 0 : i32
    %c0_i32_1 = arith.constant 0 : i32
    return %c0_i32, %c0_i32_0 : i32, i32
  }
  func.func @transform_5(%arg0: i32) -> (i32, i32) {
    %c0_i32 = arith.constant 0 : i32
    %c0_i32_0 = arith.constant 0 : i32
    %c0_i32_1 = arith.constant 0 : i32
    return %c0_i32, %c0_i32_0 : i32, i32
  }
  func.func @transform_6(%arg0: i32) -> (i32, i32) {
    %c0_i32 = arith.constant 0 : i32
    %c0_i32_0 = arith.constant 0 : i32
    %c0_i32_1 = arith.constant 0 : i32
    return %c0_i32, %c0_i32_0 : i32, i32
  }
  func.func @transform_7(%arg0: i32) -> (i32, i32) {
    %c0_i32 = arith.constant 0 : i32
    %c0_i32_0 = arith.constant 0 : i32
    %c0_i32_1 = arith.constant 0 : i32
    return %c0_i32, %c0_i32_0 : i32, i32
  }
  func.func @transform_8(%arg0: i32) -> (i32, i32) {
    %c0_i32 = arith.constant 0 : i32
    %c0_i32_0 = arith.constant 0 : i32
    %c0_i32_1 = arith.constant 0 : i32
    return %c0_i32, %c0_i32_0 : i32, i32
  }
  func.func @transform_9(%arg0: i32) -> (i32, i32, i32) {
    %c0_i32 = arith.constant 0 : i32
    %c0_i32_0 = arith.constant 0 : i32
    %c0_i32_1 = arith.constant 0 : i32
    return %arg0, %c0_i32, %c0_i32_0 : i32, i32, i32
  }
  func.func @transform_10(%arg0: i32) -> (i32, i32, i32) {
    %c0_i32 = arith.constant 0 : i32
    %c0_i32_0 = arith.constant 0 : i32
    %c0_i32_1 = arith.constant 0 : i32
    return %arg0, %c0_i32, %c0_i32_0 : i32, i32, i32
  }
}

</mosaic_0001>

<bundles_post_ra>
// kernel: tpu_custom_call.1
= control target key start
LH: loop header
LB: loop body
LE: loop exit
PB: predicated region body
PF: predicated region fallthrough
CT: control target
= control target key end

     0   :  { %s3036_s0 = inlined_call_operand.hbm [shape: bf16[2,8,32], index: 0, kind: input, shape index: {}]   ;;  %s3037_s1 = inlined_call_operand.hbm [shape: bf16[32,32], index: 1, kind: input, shape index: {}]   ;;  %s3038_s2 = inlined_call_operand.hbm [shape: bf16[32,32], index: 2, kind: input, shape index: {}]   ;;  %s3039_s3 = inlined_call_operand.hbm [shape: bf16[32,32], index: 3, kind: input, shape index: {}]   ;;  %s3040_s4 = inlined_call_operand.hbm [shape: bf16[32,32], index: 4, kind: input, shape index: {}]   ;;  %s3041_s5 = inlined_call_operand.vmem [shape: f32[1,32], index: 5, kind: input, shape index: {}]   ;;  %s3042_s6 = inlined_call_operand.vmem [shape: f32[1,32], index: 6, kind: input, shape index: {}]   ;;  %s3043_s7 = inlined_call_operand.vmem [shape: f32[1,32], index: 7, kind: input, shape index: {}]   ;;  %s3044_s8 = inlined_call_operand.vmem [shape: f32[1,32], index: 8, kind: input, shape index: {}]   ;;  %s3045_s9 = inlined_call_operand.hbm [shape: f32[2,8,32], index: 9, kind: output, shape index: {0}]   ;;  %s3046_s10 = inlined_call_operand.hbm [shape: f32[2,8,8], index: 10, kind: output, shape index: {1}]  }
   0x1   :  { %3051 = sst [smem:[#allocation19_spill]] %s3036_s0 }
   0x2   :  { %3052 = sst [smem:[#allocation20_spill]] %s3037_s1 }
   0x3   :  { %3053 = sst [smem:[#allocation21_spill]] %s3044_s8 }
   0x4   :  { %3054 = sst [smem:[#allocation22_spill]] %s3045_s9 }
   0x5   :  { %16 = vsyncpa [#allocation3], 0 }
   0x6   :  { %18 = vsyncpa [#allocation3 + $0x1], 0 }
   0x7   :  { %19 = vsyncpa [#allocation6], 0 }
   0x8   :  { %20 = vsyncpa [#allocation9], 0 }
   0x9   :  { %21 = vsyncpa [#allocation4], 0 }
   0xa   :  { %23 = vsyncpa [#allocation4 + $0x1], 0 }
   0xb   :  { %24 = vsyncpa [#allocation13], 0 }
   0xc   :  { %26 = vsyncpa [#allocation13 + $0x1], 0  ;;  %s2528_s13 = smov 0   ;;  %s2530_s14 = smov 0  }
   0xd   :  { %s2532_s15 = smov 0   ;;  %s2534_s16 = smov 0  }
   0xe LB: > { %s2454_s17 = smov [#allocation5]   ;;  %s2549_s19 = sadd.s32 4294967295, %s2452_s16   ;;  %s2452_s16 = sphi %s2534_s16, %s3079_s16   ;;  %s2448_s15 = sphi %s2532_s15, %s3078_s15   ;;  %s2444_s14 = sphi %s2530_s14, %s3077_s14   ;;  %s2440_s13 = sphi %s2528_s13, %s3076_s13  }
   0xf   : > { %s295_s18 = sshll.u32 %s2454_s17, 4  ;;  %p1914_p0 = scmp.ge.s32.totalorder %s2452_s16, 1  ;;  %s2554_s18 = int_to_ptr.vmem [resolvable:$true] %s295_s18 }
  0x10   : > { %p3048_p1 = scmp.eq.s32.totalorder %s2549_s19, 0  ;;  %p283_p2 = scmp.lt.s32.totalorder %s2452_s16, 3 }
  0x11   : > { %s2455_s21 = smov [#allocation8]   ;;  %s2456_s24 = smov [#allocation7]  }
  0x12   : > { %p2556_p3 = pnand %p1914_p0, %p283_p2  ;;  %s321_s22 = sshll.u32 %s2455_s21, 4  ;;  %s2569_s22 = int_to_ptr.vmem [resolvable:$true] %s321_s22 }
  0x13   : > { %s308_s25 = sshll.u32 %s2456_s24, 4  ;;  %s3057_s1 = sld [smem:[#allocation20_spill]]  ;;  %s2571_s25 = int_to_ptr.vmem [resolvable:$true] %s308_s25 }
  0x14   : > { %s3055_s20 = scalar_select %p2556_p3, 1, 0 }
  0x15   : > { %p2098_p5 = pneg %p2556_p3 }
  0x17   : > { %p2565_p6 = pnand %p2098_p5, %p3048_p1 }
  0x19   : > { %s2204_s28 = scalar_lea.hbm %s3057_s1, 256  ;;  %p2581_p8 = pneg %p2565_p6 }
  0x1a   : > { %p2205_p7 = scmp.ne.s32.totalorder %s3057_s1, %s2204_s28  ;;  %p2211_p11 = scmp.lt.u32.totalorder %s2204_s28, %s3057_s1 }
  0x1c   : > { %p2207_p9 = pnand %p2581_p8, %p2205_p7 }
  0x1e   : > { %p2208_p10 = pneg %p2207_p9 }
  0x20   : > { %p2213_p12 = pnand %p2211_p11, %p2208_p10 }
  0x22   : > { %2216 = shalt.err (!%p2213_p12)
}
  0x23   : > { %s2217_s21 = scalar_lea.vmem %s2554_s18, 256  ;;  %p2225_p5 = scmp.lt.s32.totalorder %s2554_s18, %s2554_s18 }
  0x24   : > { %p2218_p13 = scmp.ne.s32.totalorder %s2554_s18, %s2217_s21  ;;  %p2226_p4 = scmp.lt.s32.totalorder %s2217_s21, %s2217_s21 }
  0x26   : > { %p2220_p0 = pnand %p2218_p13, %p2581_p8  ;;  %p2227_p7 = por %p2226_p4, %p2225_p5 }
  0x28   : > { %p2221_p2 = pneg %p2220_p0 }
  0x2a   : > { %p2228_p9 = pnand %p2227_p7, %p2221_p2 }
  0x2c   : > { %2231 = shalt.err (!%p2228_p9)
}
  0x2d   : > { %s2457_s24 = smov 64   ;;  %s2458_s26 = smov 4  }
  0x2e   : > { %2101 = dma.hbm_to_vmem [thread:$0]  (!%p2565_p6), %s3057_s1, 256, %s2554_s18, [#allocation6], %s2457_s24, %s2457_s24, %s2458_s26  }
  0x2f   : > { %s2232_s12 = scalar_lea.hbm %s3039_s3, 256 }
  0x30   : > { %p2233_p4 = scmp.ne.s32.totalorder %s3039_s3, %s2232_s12  ;;  %p2239_p12 = scmp.lt.u32.totalorder %s2232_s12, %s3039_s3 }
  0x32   : > { %p2235_p10 = pnand %p2233_p4, %p2581_p8 }
  0x34   : > { %p2236_p11 = pneg %p2235_p10 }
  0x36   : > { %p2241_p13 = pnand %p2239_p12, %p2236_p11 }
  0x38   : > { %2244 = shalt.err (!%p2241_p13)
}
  0x39   : > { %s2245_s18 = scalar_lea.vmem %s2569_s22, 256  ;;  %p2253_p7 = scmp.lt.s32.totalorder %s2569_s22, %s2569_s22 }
  0x3a   : > { %p2246_p0 = scmp.ne.s32.totalorder %s2569_s22, %s2245_s18  ;;  %p2254_p9 = scmp.lt.s32.totalorder %s2245_s18, %s2245_s18 }
  0x3c   : > { %p2248_p2 = pnand %p2246_p0, %p2581_p8  ;;  %p2255_p4 = por %p2254_p9, %p2253_p7 }
  0x3e   : > { %p2249_p5 = pneg %p2248_p2 }
  0x40   : > { %p2256_p10 = pnand %p2255_p4, %p2249_p5 }
  0x42   : > { %2259 = shalt.err (!%p2256_p10)
}
  0x43   : > { %2107 = dma.hbm_to_vmem [thread:$0]  (!%p2565_p6), %s3039_s3, 256, %s2569_s22, [#allocation9], %s2457_s24, %s2457_s24, %s2458_s26  }
  0x44   : > { %s2260_s29 = scalar_lea.hbm %s3038_s2, 256 }
  0x45   : > { %p2261_p11 = scmp.ne.s32.totalorder %s3038_s2, %s2260_s29  ;;  %p2267_p0 = scmp.lt.u32.totalorder %s2260_s29, %s3038_s2 }
  0x47   : > { %p2263_p12 = pnand %p2261_p11, %p2581_p8 }
  0x49   : > { %p2264_p13 = pneg %p2263_p12 }
  0x4b   : > { %p2269_p2 = pnand %p2267_p0, %p2264_p13 }
  0x4d   : > { %2272 = shalt.err (!%p2269_p2)
}
  0x4e   : > { %s2273_s22 = scalar_lea.vmem %s2571_s25, 256  ;;  %p2281_p4 = scmp.lt.s32.totalorder %s2571_s25, %s2571_s25 }
  0x4f   : > { %p2274_p5 = scmp.ne.s32.totalorder %s2571_s25, %s2273_s22  ;;  %p2282_p10 = scmp.lt.s32.totalorder %s2273_s22, %s2273_s22 }
  0x51   : > { %p2276_p7 = pnand %p2274_p5, %p2581_p8  ;;  %p2283_p11 = por %p2282_p10, %p2281_p4 }
  0x53   : > { %p2277_p9 = pneg %p2276_p7 }
  0x55   : > { %p2284_p12 = pnand %p2283_p11, %p2277_p9 }
  0x57   : > { %2287 = shalt.err (!%p2284_p12)
}
  0x58   : > { %2104 = dma.hbm_to_vmem [thread:$0]  (!%p2565_p6), %s3038_s2, 256, %s2571_s25, [#allocation6], %s2457_s24, %s2457_s24, %s2458_s26  }
  0x59   : > { %s2459_s9 = smov [#allocation10]   ;;  %s2288_s30 = scalar_lea.hbm %s3040_s4, 256 }
  0x5a   : > { %s334_s27 = sshll.u32 %s2459_s9, 4  ;;  %p2289_p13 = scmp.ne.s32.totalorder %s3040_s4, %s2288_s30  ;;  %s335_s27 = int_to_ptr.vmem [resolvable:$true] %s334_s27 }
  0x5b   : > { %p2295_p5 = scmp.lt.u32.totalorder %s2288_s30, %s3040_s4 }
  0x5c   : > { %p2291_p0 = pnand %p2289_p13, %p2581_p8 }
  0x5e   : > { %p2292_p2 = pneg %p2291_p0 }
  0x60   : > { %p2297_p7 = pnand %p2295_p5, %p2292_p2 }
  0x62   : > { %2300 = shalt.err (!%p2297_p7)
}
  0x63   : > { %s2301_s25 = scalar_lea.vmem %s335_s27, 256  ;;  %p2309_p11 = scmp.lt.s32.totalorder %s335_s27, %s335_s27 }
  0x64   : > { %p2302_p9 = scmp.ne.s32.totalorder %s335_s27, %s2301_s25  ;;  %p2310_p12 = scmp.lt.s32.totalorder %s2301_s25, %s2301_s25 }
  0x66   : > { %p2304_p4 = pnand %p2302_p9, %p2581_p8  ;;  %p2311_p1 = por %p2310_p12, %p2309_p11 }
  0x68   : > { %p2305_p10 = pneg %p2304_p4 }
  0x6a   : > { %p2312_p3 = pnand %p2311_p1, %p2305_p10 }
  0x6c   : > { %2315 = shalt.err (!%p2312_p3)
}
  0x6d   : > { %2110 = dma.hbm_to_vmem [thread:$0]  (!%p2565_p6), %s3040_s4, 256, %s335_s27, [#allocation9], %s2457_s24, %s2457_s24, %s2458_s26  }
  0x6e   : > { %s1913_s23 = sadd.s32 4294967294, %s2452_s16   ;;  %s2680_s11 = sadd.s32 1, %s2452_s16  }
  0x6f   : > { %s36_s9 = ssub.s32 %s2452_s16, %s2680_s11  ;;  %s39_s28 = sadd.s32 1, %s2448_s15 }
  0x70   : > { %p37_p1 = scmp.eq.s32.totalorder %s36_s9, 0  ;;  %p46_p3 = scmp.ne.s32.totalorder %s2448_s15, %s2444_s14 }
  0x71   : > { %p47_p8 = scmp.eq.s32.totalorder %s2452_s16, 0  ;;  %p52_p13 = scmp.ne.s32.totalorder %s2444_s14, %s2440_s13 }
  0x72   : > { %s2691_s29 = scalar_select %p37_p1, %s2448_s15, %s39_s28  }
  0x73   : > { %p2693_p0 = por %p47_p8, %p46_p3  ;;  %p3060_p2 = scmp.eq.s32.totalorder %s2549_s19, 0 }
  0x74   : > { %p244_p5 = scmp.eq.s32.totalorder %s2549_s19, 1  ;;  %p250_p7 = scmp.eq.s32.totalorder %s1913_s23, 1 }
  0x75   : > { %p2699_p6 = por %p3060_p2, %p52_p13  ;;  %p2126_p9 = scmp.lt.s32.totalorder %s2452_s16, 2 }
  0x76   : > { %s360_s26 = sand.u32 1, %s2448_s15   ;;  %p2706_p4 = por %p244_p5, %p46_p3 }
  0x77   : > { %p2710_p10 = por %p250_p7, %p52_p13  ;;  %s1920_s17 = sshll.u32 %s360_s26, 2 }
  0x78   : > { %s3062_s27 = scalar_select %p2706_p4, 1, 0 }
  0x79   : > { %s3063_s12 = scalar_select %p2710_p10, 1, 0 }
  0x7a   : > { %s1921_s21 = sshll.u32 %s2452_s16, 6  ;;  %s3064_s0 = sld [smem:[#allocation19_spill]] }
  0x7b   : > { %s364_s8 = scalar_lea.vmem [#allocation2], %s1920_s17  ;;  %p2724_p11 = pnand %p2126_p9, %p2693_p0 }
  0x7c   : > { %s371_s23 = sshll.u32 %s364_s8, 4  ;;  %s361_s28 = scalar_lea.sflag [#allocation3], %s360_s26  ;;  %s2720_s23 = int_to_ptr.vmem [resolvable:$true] %s371_s23 }
  0x7d   : > { %p2318_p1 = pneg %p2724_p11 }
  0x80   : > { %s2718_s18 = scalar_lea.hbm %s3064_s0, %s1921_s21  ;;  %s2321_s22 = scalar_lea.hbm %s3064_s0, 128 }
  0x81   : > { %s2316_s1 = scalar_lea.hbm %s2718_s18, 64  ;;  %p2322_p13 = scmp.lt.u32.totalorder %s2718_s18, %s3064_s0 }
  0x82   : > { %p2317_p12 = scmp.ne.s32.totalorder %s2718_s18, %s2316_s1  ;;  %p2323_p0 = scmp.lt.u32.totalorder %s2321_s22, %s2316_s1 }
  0x83   : > { %p2325_p5 = scmp.lt.u32.totalorder %s2316_s1, %s2718_s18 }
  0x84   : > { %p2319_p3 = pnand %p2318_p1, %p2317_p12  ;;  %p2324_p2 = por %p2323_p0, %p2322_p13 }
  0x86   : > { %p2320_p8 = pneg %p2319_p3  ;;  %p2326_p7 = por %p2325_p5, %p2324_p2 }
  0x88   : > { %p2327_p9 = pnand %p2326_p7, %p2320_p8 }
  0x8a   : > { %2330 = shalt.err (!%p2327_p9)
}
  0x8b   : > { %s2331_s26 = scalar_lea.vmem %s2720_s23, 64  ;;  %s2460_s8 = smov [#allocation2]  }
  0x8c   : > { %p2332_p12 = scmp.ne.s32.totalorder %s2720_s23, %s2331_s26  ;;  %s2336_s17 = sshll.u32 %s2460_s8, 4  ;;  %s2337_s17 = int_to_ptr.vmem [resolvable:$false] %s2336_s17 }
  0x8d   : > { %s2338_s21 = scalar_lea.vmem %s2337_s17, 128  ;;  %p2339_p4 = scmp.lt.s32.totalorder %s2720_s23, %s2337_s17 }
  0x8e   : > { %p2334_p3 = pnand %p2332_p12, %p2318_p1  ;;  %p2340_p13 = scmp.lt.s32.totalorder %s2338_s21, %s2331_s26 }
  0x90   : > { %p2335_p10 = pneg %p2334_p3  ;;  %p2341_p0 = por %p2340_p13, %p2339_p4 }
  0x92   : > { %p2342_p2 = pnand %p2341_p0, %p2335_p10 }
  0x94   : > { %2345 = shalt.err (!%p2342_p2)
}
  0x95   : > { %2114 = dma.hbm_to_vmem [thread:$0]  (!%p2724_p11), %s2718_s18, 64, %s2720_s23, %s361_s28  }
  0x96   : > { %p3066_p8 = scmp.ne.s32.totalorder %s3055_s20, 0 }
  0x97   : > { %s2756_s1 = sand.u32 (!%p3066_p8), 1, %s2444_s14  }
  0x98   : > { %380 = sbr.rel (%p3066_p8) target bundleno = 1701 (0x6a5), region = 56  ;;  %s1923_s22 = sshll.u32 (!%p3066_p8), %s2756_s1, 2 }
  0x99   : > { %s383_s30 = scalar_lea.sflag (!%p3066_p8), [#allocation3], %s2756_s1  ;;  %s386_s25 = scalar_lea.vmem (!%p3066_p8), [#allocation2], %s1923_s22 }
  0x9f   : > { %2419 = dma.done.wait (%p2699_p6), %s383_s30, 64  }
  0xa0   : > { %2421 = vsyncadd (%p2699_p6), %s383_s30, 4294967232  ;;  %p3067_p4 = scmp.eq.s32.totalorder %s2549_s19, 0 }
  0xa2   : > { %2423 = dma.done.wait (%p3067_p4), [#allocation6], 512   ;;  %p3068_p10 = pmov %p3067_p4 }
  0xa3   : > { %p3069_p11 = pmov %p3067_p4 }
  0xa4   : > { %2425 = vsyncadd (%p3068_p10), [#allocation6], 4294966784 }
  0xa5   : > { %2427 = dma.done.wait (%p3069_p11), [#allocation9], 512   ;;  %p3070_p1 = pmov %p3067_p4 }
  0xa6   : > { %v2461_v0 = vmov 0.0   ;;  %vm2462_vm0 = vmmov 0   ;;  %v2180_v1 = vld [vmem:[#allocation7] sm:$0xff]   ;;  %v2181_v2 = vld [vmem:[#allocation5] sm:$0xff]   ;;  %v2182_v3 = vld [vmem:[#allocation7 + $0x8] sm:$0xff]   ;;  %vm469_vm1 = vcmask 261120   ;;  %v654_v22 = vlaneseq }
  0xa7   : > { %2429 = vsyncadd (%p3070_p1), [#allocation9], 4294966784  ;;  %2004 = vmatprep.subr.bf16.mxu1 %v2461_v0  ;;  %1996 = vmatprep.subr.bf16.mxu0 %v2461_v0  ;;  %v445_v4 = vld [vmem:[%s386_s25] sm:$0xf]  ;;  %v2183_v5 = vld [vmem:[#allocation5 + $0x8] sm:$0xff]   ;;  %s2463_s9 = smov 104  }
  0xa8   : > { %2008 = vmatprep.mubr.msk.bf16.mxu1 %vm2462_vm0, %v2461_v0  ;;  %2000 = vmatprep.mubr.msk.bf16.mxu0 %vm2462_vm0, %v2461_v0  ;;  %v1934_v6 = vld [vmem:[%s3042_s6] ss:$0 sm:$0xff]  ;;  %v2184_v12 = vld [vmem:[#allocation8] sm:$0xff]   ;;  %s2464_s28 = smov 120   ;;  %v2185_v19 = vld [vmem:[#allocation8 + $0x8] sm:$0xff]   ;;  %s2465_s26 = smov 112  }
  0xa9   : > { %2005 = vmatpush3.bf16.msra.mxu1 %v2180_v1  ;;  %1997 = vmatpush3.bf16.msra.mxu0 %v2181_v2  ;;  %v1930_v8 = vld [vmem:[%s3041_s5] ss:$0 sm:$0xff]  ;;  %v2466_v20 = vmov 1983009808   ;;  %v2467_v23 = vmov 1934713408  }
  0xaa   : > { %2006 = vmatprep.subr.bf16.mxu1 %v2461_v0  ;;  %1998 = vmatprep.subr.bf16.mxu0 %v2461_v0  ;;  %v652_v21 = vunpack.c.l.s4 %v2466_v20  ;;  %v684_v24 = vunpack.c.l.s4 %v2467_v23  ;;  %v655_v26 = vshrl.u32 %v654_v22, 7  ;;  %vm1089_vm2 = vcmask 64512   ;;  %s1928_s21 = sshll.u32 %s2756_s1, 3  ;;  %s2468_s30 = smov 16  }
  0xab   : > { %vm1338_vm3 = vcmask 1043456   ;;  %s2931_s22 = scalar_lea.vmem [#allocation12], %s1928_s21  ;;  %s2469_s25 = smov 8   ;;  %vm1669_vm4 = vcmask 130048   ;;  %vm1671_vm5 = vcmask 195584  }
  0xac   : > { %v653_v25 = vunpack.c.0.s8 %v652_v21  ;;  %v685_v29 = vunpack.c.0.s8 %v684_v24  ;;  %s2470_s20 = smov 24   ;;  %s1964_s24 = sshll.u32 %s2549_s19, 7 }
  0xad   : > { %2007 = vmatpush3.bf16.msra.mxu1 %v2182_v3  ;;  %1999 = vmatpush3.bf16.msra.mxu0 %v2183_v5  ;;  %p3071_p5 = scmp.ne.s32.totalorder %s3062_s27, 0  ;;  %s2471_s17 = smov [#allocation12]  }
  0xae   : > { %2020 = vmatprep.subr.bf16.mxu1 %v2461_v0  ;;  %2012 = vmatprep.subr.bf16.mxu0 %v2461_v0  ;;  %v2805_v30 = vsub.s32 %v653_v25, %v655_v26  ;;  %v2807_v37 = vsub.s32 %v685_v29, %v655_v26 }
  0xb0   : > { %2009 = vmatmul.mubr.msk.bf16.vlgmr.msra.gmra.mrb[0].mxu1 %vm469_vm1, %v445_v4  ;;  %2001 = vmatmul.mubr.msk.bf16.vlgmr.msra.gmra.mrb[0].mxu0 %vm469_vm1, %v445_v4 }
  0xb1   : > { %2022 = vmatprep.mubr.msk.bf16.mxu1 %vm2462_vm0, %v2461_v0  ;;  %2016 = vmatprep.mubr.msk.bf16.mxu0 %vm2462_vm0, %v2461_v0 }
  0xb2   : > { %2013 = vmatpush3.bf16.msra.mxu0 %v2184_v12 }
  0xb3   : > { %2014 = vmatprep.subr.bf16.mxu0 %v2461_v0 }
  0xb6   : > { %2015 = vmatpush3.bf16.msra.mxu0 %v2185_v19 }
  0xb7   : > { %2026 = vmatprep.subr.bf16.mxu0 %v2461_v0 }
  0xb9   : > { %2017 = vmatmul.mubr.msk.bf16.vlgmr.msra.gmra.mrb[4].mxu0 %vm469_vm1, %v445_v4 }
  0xba   : > { %2028 = vmatprep.mubr.msk.bf16.mxu0 %vm2462_vm0, %v2461_v0 }
 0x183   : > { %v570_v7 = vpop.f32.mrb[0].mxu1  ;;  %v507_v11 = vpop.f32.mrb[0].mxu0 }
 0x184   : > { %v571_v9 = vadd.f32 %v1934_v6, %v570_v7  ;;  %v2010_v10 = vpop.f32.mrb[1].mxu1  ;;  %v2002_v14 = vpop.f32.mrb[1].mxu0  ;;  %v508_v16 = vadd.f32 %v1930_v8, %v507_v11 }
 0x185   : > { %v573_v13 = vpop.f32.mrb[2].mxu1  ;;  %v510_v17 = vpop.f32.mrb[2].mxu0 }
 0x186   : > { %796 = vrot.lane.b32.xlu1 %v571_v9, %s2463_s9  ;;  %790 = vrot.lane.b32.xlu0 %v571_v9, %s2464_s28  ;;  %v2011_v15 = vpop.f32.mrb[3].mxu1  ;;  %v2003_v18 = vpop.f32.mrb[3].mxu0 }
 0x18a   : > { %793 = vrot.lane.b32.xlu0 %v571_v9, %s2465_s26  ;;  %640 = vrot.lane.b32.xlu1 %v508_v16, %s2464_s28 }
 0x18e   : > { %643 = vrot.lane.b32.xlu0 %v508_v16, %s2465_s26  ;;  %646 = vrot.lane.b32.xlu1 %v508_v16, %s2463_s9 }
 0x1f8   : > { %v797_v27 = vpop.permute.xlu1 %796  ;;  %v791_v28 = vpop.permute.xlu0 %790 }
 0x1f9   : > { %v815_v31 = vcombine.low %v791_v28, %v797_v27  ;;  %v816_v32 = vcombine.high %v791_v28, %v797_v27 }
 0x1fb   : > { %v823_v38 = vrot.slane %v815_v31, %v2805_v30  ;;  %v830_v39 = vrot.slane %v816_v32, %v2805_v30 }
 0x1fc   : > { %v794_v33 = vpop.permute.xlu0 %793  ;;  %v641_v34 = vpop.permute.xlu1 %640 }
 0x1fd   : > { %v799_v35 = vcombine.low %v571_v9, %v794_v33  ;;  %v800_v36 = vcombine.high %v571_v9, %v794_v33 }
 0x1ff   : > { %v807_v40 = vrot.slane %v799_v35, %v2805_v30  ;;  %v814_v41 = vrot.slane %v800_v36, %v2805_v30 }
 0x200   : > { %v644_v42 = vpop.permute.xlu0 %643  ;;  %v647_v43 = vpop.permute.xlu1 %646 }
 0x201   : > { %v831_v44 = vcombine.low %v807_v40, %v823_v38  ;;  %v832_v45 = vcombine.high %v807_v40, %v823_v38  ;;  %v847_v46 = vcombine.low %v814_v41, %v830_v39  ;;  %v848_v47 = vcombine.high %v814_v41, %v830_v39 }
 0x202   : > { %v649_v48 = vcombine.low %v508_v16, %v644_v42  ;;  %v650_v49 = vcombine.high %v508_v16, %v644_v42  ;;  %v665_v50 = vcombine.low %v641_v34, %v647_v43  ;;  %v666_v51 = vcombine.high %v641_v34, %v647_v43 }
 0x203   : > { %v839_v52 = vrot.slane %v831_v44, %v2807_v37  ;;  %v846_v53 = vrot.slane %v832_v45, %v2807_v37  ;;  %v855_v54 = vrot.slane %v847_v46, %v2807_v37  ;;  %v862_v55 = vrot.slane %v848_v47, %v2807_v37 }
 0x204   : > { %v657_v56 = vrot.slane %v649_v48, %v2805_v30  ;;  %v664_v57 = vrot.slane %v650_v49, %v2805_v30  ;;  %v673_v58 = vrot.slane %v665_v50, %v2805_v30  ;;  %v680_v59 = vrot.slane %v666_v51, %v2805_v30 }
 0x205   : > { %v867_v60 = vcombine.low %v839_v52, %v846_v53  ;;  %v1944_v61 = vcombine.high %v839_v52, %v846_v53  ;;  %v883_v62 = vcombine.low %v855_v54, %v862_v55  ;;  %v1945_v63 = vcombine.high %v855_v54, %v862_v55 }
 0x206   : > { %v681_v1 = vcombine.low %v657_v56, %v673_v58  ;;  %v682_v2 = vcombine.high %v657_v56, %v673_v58  ;;  %v697_v3 = vcombine.low %v664_v57, %v680_v59  ;;  %v698_v4 = vcombine.high %v664_v57, %v680_v59  ;;  %v633_v59 = vpop.f32.mrb[4].mxu0 }
 0x207   : > { %v874_v5 = vrot.slane %v867_v60, %v2805_v30  ;;  %v882_v6 = vrot.slane %v1944_v61, %v2805_v30  ;;  %v890_v7 = vrot.slane %v883_v62, %v2805_v30  ;;  %v898_v8 = vrot.slane %v1945_v63, %v2805_v30  ;;  %v2018_v60 = vpop.f32.mrb[5].mxu0 }
 0x208   : > { %v689_v9 = vrot.slane %v681_v1, %v2807_v37  ;;  %v696_v10 = vrot.slane %v682_v2, %v2807_v37  ;;  %v705_v11 = vrot.slane %v697_v3, %v2807_v37  ;;  %v712_v12 = vrot.slane %v698_v4, %v2807_v37  ;;  %v636_v61 = vpop.f32.mrb[6].mxu0 }
 0x209   : > { %v899_v13 = vcombine.low %v874_v5, %v882_v6  ;;  %v915_v14 = vcombine.low %v890_v7, %v898_v8  ;;  %v900_v15 = vcombine.high %v874_v5, %v882_v6  ;;  %v916_v16 = vcombine.high %v890_v7, %v898_v8  ;;  %v2019_v62 = vpop.f32.mrb[7].mxu0 }
 0x20a   : > { %v717_v17 = vcombine.low %v689_v9, %v696_v10  ;;  %v1942_v18 = vcombine.high %v689_v9, %v696_v10  ;;  %v733_v19 = vcombine.low %v705_v11, %v712_v12  ;;  %v1943_v20 = vcombine.high %v705_v11, %v712_v12 }
 0x20b   : > { %v907_v21 = vrot.slane %v899_v13, %v2807_v37  ;;  %v923_v22 = vrot.slane %v915_v14, %v2807_v37  ;;  %v914_v29 = vrot.slane %v900_v15, %v2807_v37  ;;  %v930_v31 = vrot.slane %v916_v16, %v2807_v37 }
 0x20c   : > { %v724_v23 = vrot.slane %v717_v17, %v2805_v30  ;;  %v732_v24 = vrot.slane %v1942_v18, %v2805_v30  ;;  %v740_v25 = vrot.slane %v733_v19, %v2805_v30  ;;  %v748_v26 = vrot.slane %v1943_v20, %v2805_v30 }
 0x20d   : > { %v931_v27 = vcombine.low %v907_v21, %v923_v22  ;;  %v932_v28 = vcombine.high %v907_v21, %v923_v22  ;;  %v933_v41 = vcombine.low %v914_v29, %v930_v31  ;;  %v934_v42 = vcombine.high %v914_v29, %v930_v31 }
 0x20e   : > { %v749_v32 = vcombine.low %v724_v23, %v732_v24  ;;  %v765_v33 = vcombine.low %v740_v25, %v748_v26  ;;  %v750_v43 = vcombine.high %v724_v23, %v732_v24  ;;  %v766_v44 = vcombine.high %v740_v25, %v748_v26  ;;  %v1938_v24 = vld [vmem:[%s3043_s7] ss:$0 sm:$0xff] }
 0x20f   : > { %v935_v34 = vpack.c.bf16 %v931_v27, %v931_v27  ;;  %v936_v35 = vpack.c.bf16 %v932_v28, %v932_v28  ;;  %v937_v47 = vpack.c.bf16 %v933_v41, %v933_v41  ;;  %v938_v48 = vpack.c.bf16 %v934_v42, %v934_v42 }
 0x210   : > { %v757_v36 = vrot.slane %v749_v32, %v2807_v37  ;;  %v773_v38 = vrot.slane %v765_v33, %v2807_v37  ;;  %v764_v51 = vrot.slane %v750_v43, %v2807_v37  ;;  %v780_v52 = vrot.slane %v766_v44, %v2807_v37 }
 0x211   : > { %v1094_v39 = vsel %vm1089_vm2, %v935_v34, 0  ;;  %v1140_v40 = vsel %vm1089_vm2, %v936_v35, 0  ;;  %v1186_v53 = vsel %vm1089_vm2, %v937_v47, 0  ;;  %v1232_v54 = vsel %vm1089_vm2, %v938_v48, 0 }
 0x212   : > { %2021 = vmatpush3.bf16.xpose.msra.mxu1 %v1094_v39  ;;  %2027 = vmatpush3.bf16.xpose.msra.mxu0 %v1140_v40  ;;  %v781_v45 = vcombine.low %v757_v36, %v773_v38  ;;  %v782_v46 = vcombine.high %v757_v36, %v773_v38  ;;  %v783_v55 = vcombine.low %v764_v51, %v780_v52 }
 0x213   : > { %2032 = vmatprep.subr.bf16.mxu1 %v2461_v0  ;;  %2038 = vmatprep.subr.bf16.mxu0 %v2461_v0  ;;  %v784_v56 = vcombine.high %v764_v51, %v780_v52  ;;  %v634_v25 = vadd.f32 %v1938_v24, %v633_v59 }
 0x214   : > { %v785_v49 = vpack.c.bf16 %v781_v45, %v781_v45  ;;  %v786_v50 = vpack.c.bf16 %v782_v46, %v782_v46  ;;  %v787_v57 = vpack.c.bf16 %v783_v55, %v783_v55 }
 0x215   : > { %v788_v58 = vpack.c.bf16 %v784_v56, %v784_v56 }
 0x219   : > { %2023 = vmatmul.mubr.msk.bf16.vlgmr.msra.gmra.mrb[4].mxu1 %vm1089_vm2, %v785_v49  ;;  %2029 = vmatmul.mubr.msk.bf16.vlgmr.msra.gmra.mrb[8].mxu0 %vm1089_vm2, %v786_v50 }
 0x21a   : > { %2033 = vmatpush3.bf16.xpose.msra.mxu1 %v1186_v53  ;;  %2039 = vmatpush3.bf16.xpose.msra.mxu0 %v1232_v54 }
 0x21b   : > { %2034 = vmatprep.mubr.msk.bf16.mxu1 %vm2462_vm0, %v2461_v0  ;;  %2040 = vmatprep.mubr.msk.bf16.mxu0 %vm2462_vm0, %v2461_v0 }
 0x21c   : > { %2044 = vmatprep.subr.bf16.mxu1 %v2461_v0  ;;  %2050 = vmatprep.subr.bf16.mxu0 %v2461_v0 }
 0x221   : > { %2035 = vmatmul.mubr.msk.bf16.vlgmr.msra.gmra.mrb[8].mxu1 %vm1089_vm2, %v787_v57  ;;  %2041 = vmatmul.mubr.msk.bf16.vlgmr.msra.gmra.mrb[12].mxu0 %vm1089_vm2, %v788_v58 }
 0x222   : > { %2046 = vmatprep.mubr.msk.bf16.mxu1 %vm2462_vm0, %v2461_v0  ;;  %2052 = vmatprep.mubr.msk.bf16.mxu0 %vm2462_vm0, %v2461_v0 }
 0x2ec   : > { %v1130_v63 = vpop.f32.mrb[4].mxu1  ;;  %v1176_v1 = vpop.f32.mrb[8].mxu0 }
 0x2ed   : > { %v1274_v2 = vmul.f32 0.35355338, %v1130_v63  ;;  %v1275_v3 = vmul.f32 0.35355338, %v1176_v1  ;;  %v2024_v4 = vpop.f32.mrb[5].mxu1  ;;  %v2030_v5 = vpop.f32.mrb[9].mxu0 }
 0x2ee   : > { %v1133_v6 = vpop.f32.mrb[6].mxu1  ;;  %v1179_v7 = vpop.f32.mrb[10].mxu0 }
 0x2ef   : > { %v2025_v8 = vpop.f32.mrb[7].mxu1  ;;  %v2031_v9 = vpop.f32.mrb[11].mxu0  ;;  %v1278_v10 = vsel %vm1089_vm2, %v1274_v2, -inf  ;;  %v1281_v11 = vsel %vm1089_vm2, %v1275_v3, -inf }
 0x2f0   : > { %1279 = vmax.xlane.f32.xlu0 %v1278_v10  ;;  %1282 = vmax.xlane.f32.xlu1 %v1281_v11 }
 0x2f4   : > { %v1222_v12 = vpop.f32.mrb[8].mxu1  ;;  %v1268_v13 = vpop.f32.mrb[12].mxu0 }
 0x2f5   : > { %v1276_v14 = vmul.f32 0.35355338, %v1222_v12  ;;  %v2036_v15 = vpop.f32.mrb[9].mxu1  ;;  %v2042_v16 = vpop.f32.mrb[13].mxu0  ;;  %v1277_v19 = vmul.f32 0.35355338, %v1268_v13 }
 0x2f6   : > { %v1225_v17 = vpop.f32.mrb[10].mxu1  ;;  %v1271_v18 = vpop.f32.mrb[14].mxu0 }
 0x2f7   : > { %v2037_v20 = vpop.f32.mrb[11].mxu1  ;;  %v2043_v21 = vpop.f32.mrb[15].mxu0  ;;  %v1284_v22 = vsel %vm1089_vm2, %v1276_v14, -inf  ;;  %v1287_v23 = vsel %vm1089_vm2, %v1277_v19, -inf }
 0x2f8   : > { %1285 = vmax.xlane.f32.xlu0 %v1284_v22 }
 0x2fc   : > { %1288 = vmax.xlane.f32.xlu0 %v1287_v23 }
 0x301   : > { %940 = vrot.lane.b32.xlu1 %v634_v25, %s2464_s28  ;;  %s1773_s28 = sshll.u32 %s2931_s22, 4  ;;  %s1774_s28 = int_to_ptr.vmem [resolvable:$true] %s1773_s28 }
 0x302   : > { %s2346_s8 = scalar_lea.vmem %s1774_s28, 128 }
 0x303   : > { %p2347_p6 = scmp.ne.s32.totalorder %s1774_s28, %s2346_s8 }
 0x305   : > { %p2348_p7 = pnand %p2347_p6, %p3071_p5 }
 0x307   : > { %p2349_p9 = pneg %p2348_p7 }
 0x37d   : > { %v1280_v26 = vpop.xlane.xlu0 %1279  ;;  %v1283_v27 = vpop.xlane.xlu1 %1282 }
 0x37e   : > { %v1290_v28 = vsub.f32 %v1274_v2, %v1280_v26  ;;  %v1291_v29 = vsub.f32 %v1275_v3, %v1283_v27 }
 0x380   : > { %v1294_v31 = vmul.f32 1.442695, %v1290_v28  ;;  %v1296_v32 = vmul.f32 1.442695, %v1291_v29 }
 0x381   : > { %v941_v48 = vpop.permute.xlu1 %940 }
 0x382   : > { %2188 = vpow2.f32 %v1294_v31 }
 0x383   : > { %2190 = vpow2.f32 %v1296_v32 }
 0x385   : > { %v1286_v38 = vpop.xlane.xlu0 %1285 }
 0x386   : > { %v1292_v40 = vsub.f32 %v1276_v14, %v1286_v38 }
 0x388   : > { %v1298_v42 = vmul.f32 1.442695, %v1292_v40 }
 0x389   : > { %v1289_v39 = vpop.xlane.xlu0 %1288 }
 0x38a   : > { %v1293_v41 = vsub.f32 %v1277_v19, %v1289_v39  ;;  %2192 = vpow2.f32 %v1298_v42 }
 0x38c   : > { %v2869_v33 = vpop.eup %2188  ;;  %v1300_v43 = vmul.f32 1.442695, %v1293_v41 }
 0x38d   : > { %v2871_v34 = vpop.eup %2190  ;;  %v1302_v35 = vsel %vm1089_vm2, %v2869_v33, 0.0 }
 0x38e   : > { %1303 = vadd.xlane.f32.xlu1 %v1302_v35  ;;  %v1305_v36 = vsel %vm1089_vm2, %v2871_v34, 0.0  ;;  %2194 = vpow2.f32 %v1300_v43 }
 0x38f   : > { %1306 = vadd.xlane.f32.xlu0 %v1305_v36 }
 0x394   : > { %v2879_v44 = vpop.eup %2192 }
 0x395   : > { %v1308_v46 = vsel %vm1089_vm2, %v2879_v44, 0.0 }
 0x398   : > { %v2881_v45 = vpop.eup %2194 }
 0x399   : > { %v1311_v47 = vsel %vm1089_vm2, %v2881_v45, 0.0 }
 0x39f   : > { %946 = vrot.lane.b32.xlu1 %v634_v25, %s2463_s9  ;;  %s2960_s9 = scalar_lea.hbm %s3046_s10, %s1964_s24 }
 0x3a5   : > { %943 = vrot.lane.b32.xlu0 %v634_v25, %s2465_s26  ;;  %s1747_s26 = scalar_lea.sflag [#allocation13], %s2756_s1 }
 0x3c3   : > { %1309 = vadd.xlane.f32.xlu1 %v1308_v46 }
 0x3c4   : > { %1312 = vadd.xlane.f32.xlu0 %v1311_v47 }
 0x41b   : > { %v1304_v49 = vpop.xlane.xlu1 %1303 }
 0x41c   : > { %v1307_v50 = vpop.xlane.xlu0 %1306  ;;  %2196 = vrcp.f32 %v1304_v49 }
 0x41d   : > { %2198 = vrcp.f32 %v1307_v50 }
 0x41f   : > { %v947_v51 = vpop.permute.xlu1 %946 }
 0x420   : > { %v965_v52 = vcombine.low %v941_v48, %v947_v51  ;;  %v966_v53 = vcombine.high %v941_v48, %v947_v51  ;;  %v944_v54 = vpop.permute.xlu0 %943 }
 0x421   : > { %v949_v55 = vcombine.low %v634_v25, %v944_v54  ;;  %v950_v56 = vcombine.high %v634_v25, %v944_v54 }
 0x422   : > { %v973_v57 = vrot.slane %v965_v52, %v2805_v30  ;;  %v980_v58 = vrot.slane %v966_v53, %v2805_v30 }
 0x423   : > { %v957_v59 = vrot.slane %v949_v55, %v2805_v30  ;;  %v964_v60 = vrot.slane %v950_v56, %v2805_v30 }
 0x425   : > { %v981_v61 = vcombine.low %v957_v59, %v973_v57  ;;  %v982_v62 = vcombine.high %v957_v59, %v973_v57  ;;  %v997_v63 = vcombine.low %v964_v60, %v980_v58  ;;  %v998_v1 = vcombine.high %v964_v60, %v980_v58 }
 0x426   : > { %v2197_v20 = vpop.eup %2196 }
 0x427   : > { %v989_v2 = vrot.slane %v981_v61, %v2807_v37  ;;  %v996_v3 = vrot.slane %v982_v62, %v2807_v37  ;;  %v1005_v4 = vrot.slane %v997_v63, %v2807_v37  ;;  %v1012_v5 = vrot.slane %v998_v1, %v2807_v37  ;;  %v2199_v23 = vpop.eup %2198 }
 0x428   : > { %v1318_v28 = vmul.f32 %v2197_v20, %v2869_v33  ;;  %v1319_v29 = vmul.f32 %v2199_v23, %v2871_v34  ;;  %v2186_v23 = vld [vmem:[#allocation10] sm:$0xff]  }
 0x429   : > { %v1017_v6 = vcombine.low %v989_v2, %v996_v3  ;;  %v1946_v7 = vcombine.high %v989_v2, %v996_v3  ;;  %v1033_v8 = vcombine.low %v1005_v4, %v1012_v5  ;;  %v1947_v9 = vcombine.high %v1005_v4, %v1012_v5 }
 0x42a   : > { %v1331_v40 = vpack.c.bf16 %v1318_v28, %v1318_v28  ;;  %v1332_v41 = vpack.c.bf16 %v1319_v29, %v1319_v29  ;;  %v1322_v46 = vsel %vm1089_vm2, %v1318_v28, 0.0  ;;  %v1323_v47 = vsel %vm1089_vm2, %v1319_v29, 0.0 }
 0x42b   : > { %v1024_v10 = vrot.slane %v1017_v6, %v2805_v30  ;;  %v1032_v11 = vrot.slane %v1946_v7, %v2805_v30  ;;  %v1040_v12 = vrot.slane %v1033_v8, %v2805_v30  ;;  %v1048_v13 = vrot.slane %v1947_v9, %v2805_v30 }
 0x42c   : > { %v1324_v51 = vadd.f32 %v1323_v47, %v1322_v46 }
 0x42d   : > { %v1049_v14 = vcombine.low %v1024_v10, %v1032_v11  ;;  %v1050_v15 = vcombine.high %v1024_v10, %v1032_v11  ;;  %v1065_v16 = vcombine.low %v1040_v12, %v1048_v13  ;;  %v1066_v17 = vcombine.high %v1040_v12, %v1048_v13 }
 0x42f   : > { %v1057_v18 = vrot.slane %v1049_v14, %v2807_v37  ;;  %v1064_v19 = vrot.slane %v1050_v15, %v2807_v37  ;;  %v1073_v21 = vrot.slane %v1065_v16, %v2807_v37  ;;  %v1080_v22 = vrot.slane %v1066_v17, %v2807_v37 }
 0x431   : > { %v1081_v24 = vcombine.low %v1057_v18, %v1073_v21  ;;  %v1082_v25 = vcombine.high %v1057_v18, %v1073_v21  ;;  %v1083_v26 = vcombine.low %v1064_v19, %v1080_v22  ;;  %v1084_v27 = vcombine.high %v1064_v19, %v1080_v22 }
 0x433   : > { %v1085_v31 = vpack.c.bf16 %v1081_v24, %v1081_v24  ;;  %v1086_v32 = vpack.c.bf16 %v1082_v25, %v1082_v25  ;;  %v1087_v38 = vpack.c.bf16 %v1083_v26, %v1083_v26  ;;  %v1088_v39 = vpack.c.bf16 %v1084_v27, %v1084_v27 }
 0x435   : > { %v1340_v35 = vsel %vm1338_vm3, %v1085_v31, 0  ;;  %v1386_v36 = vsel %vm1338_vm3, %v1086_v32, 0  ;;  %v1432_v33 = vsel %vm1338_vm3, %v1087_v38, 0  ;;  %v1478_v34 = vsel %vm1338_vm3, %v1088_v39, 0 }
 0x436   : > { %2045 = vmatpush3.bf16.msra.mxu1 %v1340_v35  ;;  %2051 = vmatpush3.bf16.msra.mxu0 %v1386_v36  ;;  %v2187_v35 = vld [vmem:[#allocation10 + $0x8] sm:$0xff]  }
 0x437   : > { %2056 = vmatprep.subr.bf16.mxu1 %v2461_v0  ;;  %2062 = vmatprep.subr.bf16.mxu0 %v2461_v0 }
 0x439   : > { %2047 = vmatmul.mubr.msk.bf16.vlgmr.msra.gmra.mrb[12].mxu1 %vm1089_vm2, %v1331_v40  ;;  %2053 = vmatmul.mubr.msk.bf16.vlgmr.msra.gmra.mrb[16].mxu0 %vm1089_vm2, %v1332_v41 }
 0x43a   : > { %2057 = vmatpush3.bf16.msra.mxu1 %v1432_v33  ;;  %2063 = vmatpush3.bf16.msra.mxu0 %v1478_v34 }
 0x43b   : > { %2058 = vmatprep.mubr.msk.bf16.mxu1 %vm2462_vm0, %v2461_v0  ;;  %2064 = vmatprep.mubr.msk.bf16.mxu0 %vm2462_vm0, %v2461_v0 }
 0x43c   : > { %2068 = vmatprep.subr.bf16.mxu1 %v2461_v0 }
 0x450   : > { %v1310_v42 = vpop.xlane.xlu1 %1309 }
 0x451   : > { %2200 = vrcp.f32 %v1310_v42  ;;  %v1313_v43 = vpop.xlane.xlu0 %1312 }
 0x452   : > { %2202 = vrcp.f32 %v1313_v43 }
 0x45b   : > { %v2201_v48 = vpop.eup %2200 }
 0x45c   : > { %v2203_v49 = vpop.eup %2202  ;;  %v1320_v50 = vmul.f32 %v2201_v48, %v2879_v44 }
 0x45d   : > { %v1321_v52 = vmul.f32 %v2203_v49, %v2881_v45 }
 0x45e   : > { %v1325_v53 = vsel %vm1089_vm2, %v1320_v50, 0.0  ;;  %v1333_v54 = vpack.c.bf16 %v1320_v50, %v1320_v50 }
 0x45f   : > { %v1326_v55 = vadd.f32 %v1325_v53, %v1324_v51  ;;  %v1334_v56 = vpack.c.bf16 %v1321_v52, %v1321_v52  ;;  %v1327_v57 = vsel %vm1089_vm2, %v1321_v52, 0.0 }
 0x460   : > { %2059 = vmatmul.mubr.msk.bf16.vlgmr.msra.gmra.mrb[16].mxu1 %vm1089_vm2, %v1333_v54 }
 0x461   : > { %2065 = vmatmul.mubr.msk.bf16.vlgmr.msra.gmra.mrb[20].mxu0 %vm1089_vm2, %v1334_v56  ;;  %2072 = vmatprep.mubr.msk.bf16.mxu1 %vm2462_vm0, %v2461_v0  ;;  %v1328_v58 = vadd.f32 %v1327_v57, %v1326_v55 }
 0x462   : > { %2069 = vmatpush3.bf16.msra.mxu1 %v2186_v23 }
 0x463   : > { %v1329_v44 = vmul.f32 0.25, %v1328_v58  ;;  %2070 = vmatprep.subr.bf16.mxu1 %v2461_v0 }
 0x465   : > { %1330 = vst.msk [vmem:[%s2931_s22] sm:$0xff] %vm1089_vm2, %v1329_v44 }
 0x466   : > { %2071 = vmatpush3.bf16.msra.mxu1 %v2187_v35 }
 0x50c   : > { %v1376_v45 = vpop.f32.mrb[12].mxu1  ;;  %v1422_v59 = vpop.f32.mrb[16].mxu0 }
 0x50d   : > { %v2048_v60 = vpop.f32.mrb[13].mxu1  ;;  %v2054_v61 = vpop.f32.mrb[17].mxu0 }
 0x50e   : > { %v1379_v62 = vpop.f32.mrb[14].mxu1  ;;  %v1425_v63 = vpop.f32.mrb[18].mxu0 }
 0x50f   : > { %v2049_v1 = vpop.f32.mrb[15].mxu1  ;;  %v2055_v2 = vpop.f32.mrb[19].mxu0 }
 0x533   : > { %v1468_v3 = vpop.f32.mrb[16].mxu1 }
 0x534   : > { %v1520_v4 = vcombine.low %v1376_v45, %v1468_v3  ;;  %v1521_v5 = vcombine.high %v1376_v45, %v1468_v3  ;;  %v1514_v6 = vpop.f32.mrb[20].mxu0  ;;  %v2060_v7 = vpop.f32.mrb[17].mxu1 }
 0x535   : > { %v1536_v8 = vcombine.low %v1422_v59, %v1514_v6  ;;  %v1537_v9 = vcombine.high %v1422_v59, %v1514_v6  ;;  %v2066_v10 = vpop.f32.mrb[21].mxu0  ;;  %v1471_v11 = vpop.f32.mrb[18].mxu1 }
 0x536   : > { %v1528_v12 = vrot.slane %v1520_v4, %v2805_v30  ;;  %v1535_v13 = vrot.slane %v1521_v5, %v2805_v30  ;;  %v1517_v14 = vpop.f32.mrb[22].mxu0  ;;  %v2061_v15 = vpop.f32.mrb[19].mxu1 }
 0x537   : > { %v1544_v16 = vrot.slane %v1536_v8, %v2805_v30  ;;  %v1551_v17 = vrot.slane %v1537_v9, %v2805_v30  ;;  %v2067_v18 = vpop.f32.mrb[23].mxu0 }
 0x539   : > { %v1552_v19 = vcombine.low %v1528_v12, %v1544_v16  ;;  %v1553_v20 = vcombine.high %v1528_v12, %v1544_v16  ;;  %v1568_v21 = vcombine.low %v1535_v13, %v1551_v17  ;;  %v1569_v22 = vcombine.high %v1535_v13, %v1551_v17 }
 0x53b   : > { %v1560_v24 = vrot.slane %v1552_v19, %v2807_v37  ;;  %v1567_v25 = vrot.slane %v1553_v20, %v2807_v37  ;;  %v1576_v26 = vrot.slane %v1568_v21, %v2807_v37  ;;  %v1583_v27 = vrot.slane %v1569_v22, %v2807_v37 }
 0x53d   : > { %v1588_v28 = vcombine.low %v1560_v24, %v1567_v25  ;;  %v1956_v29 = vcombine.high %v1560_v24, %v1567_v25  ;;  %v1604_v31 = vcombine.low %v1576_v26, %v1583_v27  ;;  %v1957_v32 = vcombine.high %v1576_v26, %v1583_v27 }
 0x53f   : > { %v1595_v36 = vrot.slane %v1588_v28, %v2805_v30  ;;  %v1603_v38 = vrot.slane %v1956_v29, %v2805_v30  ;;  %v1611_v39 = vrot.slane %v1604_v31, %v2805_v30  ;;  %v1619_v40 = vrot.slane %v1957_v32, %v2805_v30 }
 0x541   : > { %v1621_v41 = vcombine.high %v1595_v36, %v1603_v38  ;;  %v1637_v33 = vcombine.high %v1611_v39, %v1619_v40  ;;  %v1620_v34 = vcombine.low %v1595_v36, %v1603_v38  ;;  %v1636_v42 = vcombine.low %v1611_v39, %v1619_v40 }
 0x543   : > { %v1635_v0 = vrot.slane %v1621_v41, %v2807_v37  ;;  %v1651_v43 = vrot.slane %v1637_v33, %v2807_v37  ;;  %v1628_v46 = vrot.slane %v1620_v34, %v2807_v37  ;;  %v1644_v47 = vrot.slane %v1636_v42, %v2807_v37 }
 0x545   : > { %v1654_v48 = vcombine.low %v1635_v0, %v1651_v43  ;;  %v1653_v49 = vcombine.high %v1628_v46, %v1644_v47  ;;  %v1655_v50 = vcombine.high %v1635_v0, %v1651_v43  ;;  %v1652_v51 = vcombine.low %v1628_v46, %v1644_v47 }
 0x547   : > { %1661 = vrot.lane.b32.xlu1 %v1654_v48, %s2468_s30  ;;  %1657 = vrot.lane.b32.xlu0 %v1653_v49, %s2469_s25  ;;  %s2350_s30 = sshll.u32 %s2471_s17, 4  ;;  %s2351_s30 = int_to_ptr.vmem [resolvable:$false] %s2350_s30 }
 0x548   : > { %s2352_s25 = scalar_lea.vmem %s2351_s30, 256  ;;  %p2353_p12 = scmp.lt.s32.totalorder %s1774_s28, %s2351_s30 }
 0x549   : > { %p2354_p3 = scmp.lt.s32.totalorder %s2352_s25, %s2346_s8 }
 0x54b   : > { %1665 = vrot.lane.b32.xlu1 %v1655_v50, %s2470_s20  ;;  %p2355_p13 = por %p2354_p3, %p2353_p12 }
 0x54d   : > { %p2356_p0 = pnand %p2355_p13, %p2349_p9 }
 0x5b9   : > { %v1662_v30 = vpop.permute.xlu1 %1661  ;;  %v1658_v52 = vpop.permute.xlu0 %1657 }
 0x5ba   : > { %v1668_v53 = vsel %vm1089_vm2, %v1652_v51, %v1658_v52 }
 0x5bb   : > { %v1670_v54 = vsel %vm1669_vm4, %v1668_v53, %v1662_v30 }
 0x5bd   : > { %v1666_v37 = vpop.permute.xlu1 %1665 }
 0x5be   : > { %v1672_v55 = vsel %vm1671_vm5, %v1670_v54, %v1666_v37 }
 0x5bf   : > { %v1673_v56 = vpack.c.bf16 %v1672_v55, %v1672_v55 }
 0x5c1   : > { %2073 = vmatmul.mubr.msk.bf16.vlgmr.msra.gmra.mrb[20].mxu1 %vm469_vm1, %v1673_v56 }
 0x5c2   : > { %2359 = shalt.err (!%p2356_p0)
}
 0x5c3   : > { %s2360_s22 = scalar_lea.hbm %s2960_s9, 128  ;;  %s2364_s23 = scalar_lea.hbm %s3046_s10, 256 }
 0x5c4   : > { %p2361_p2 = scmp.ne.s32.totalorder %s2960_s9, %s2360_s22  ;;  %p2365_p10 = scmp.lt.u32.totalorder %s2960_s9, %s3046_s10 }
 0x5c5   : > { %p2366_p11 = scmp.lt.u32.totalorder %s2364_s23, %s2360_s22  ;;  %p2368_p6 = scmp.lt.u32.totalorder %s2360_s22, %s2960_s9 }
 0x5c6   : > { %p2362_p8 = pnand %p2361_p2, %p3071_p5 }
 0x5c7   : > { %p2367_p1 = por %p2366_p11, %p2365_p10 }
 0x5c8   : > { %p2363_p4 = pneg %p2362_p8 }
 0x5c9   : > { %p2369_p7 = por %p2368_p6, %p2367_p1 }
 0x5cb   : > { %p2370_p9 = pnand %p2369_p7, %p2363_p4 }
 0x5cd   : > { %2373 = shalt.err (!%p2370_p9)
}
 0x5ce   : > { %2095 = dma.vmem_to_hbm [thread:$0]  (%p3071_p5), %s1774_s28, 128, %s2960_s9, %s1747_s26  }
 0x5cf   : > { %s3072_s20 = sld [smem:[#allocation21_spill]]  ;;  %s436_s18 = scalar_lea.vmem [#allocation11], %s1928_s21 }
 0x5d0   : > { %s1760_s23 = sshll.u32 %s436_s18, 4  ;;  %s3073_s30 = sld [smem:[#allocation22_spill]]  ;;  %s2993_s23 = int_to_ptr.vmem [resolvable:$true] %s1760_s23 }
 0x5d1   : > { %s1742_s21 = scalar_lea.sflag [#allocation4], %s2756_s1  ;;  %s2374_s9 = scalar_lea.vmem %s2993_s23, 128 }
 0x5d2   : > { %p2375_p12 = scmp.ne.s32.totalorder %s2993_s23, %s2374_s9  ;;  %s2472_s19 = smov [#allocation11]  }
 0x5d3   : > { %s2378_s28 = sshll.u32 %s2472_s19, 4  ;;  %s2379_s28 = int_to_ptr.vmem [resolvable:$false] %s2378_s28 }
 0x5d4   : > { %p2376_p3 = pnand %p2375_p12, %p3071_p5  ;;  %p2381_p0 = scmp.lt.s32.totalorder %s2993_s23, %s2379_s28 }
 0x5d5   : > { %v1958_v57 = vld [vmem:[%s3072_s20] ss:$0 sm:$0xff] }
 0x5d6   : > { %s2991_s0 = scalar_lea.hbm %s3073_s30, %s1964_s24  ;;  %p2377_p13 = pneg %p2376_p3 }
 0x5d7   : > { %s2380_s24 = scalar_lea.vmem %s2379_s28, 256 }
 0x5d8   : > { %p2382_p2 = scmp.lt.s32.totalorder %s2380_s24, %s2374_s9 }
 0x5da   : > { %p2383_p8 = por %p2382_p2, %p2381_p0 }
 0x5dc   : > { %p2384_p4 = pnand %p2383_p8, %p2377_p13 }
 0x694   : > { %v1734_v58 = vpop.f32.mrb[20].mxu1 }
 0x695   : > { %v1735_v44 = vadd.f32 %v1958_v57, %v1734_v58  ;;  %v2074_v45 = vpop.f32.mrb[21].mxu1 }
 0x696   : > { %v1737_v59 = vpop.f32.mrb[22].mxu1 }
 0x697   : > { %v2075_v60 = vpop.f32.mrb[23].mxu1  ;;  %1740 = vst.msk [vmem:[%s436_s18] sm:$0xff] %vm469_vm1, %v1735_v44 }
 0x698   : > { %2387 = shalt.err (!%p2384_p4)
}
 0x699   : > { %s2388_s1 = scalar_lea.hbm %s2991_s0, 128  ;;  %s2392_s25 = scalar_lea.hbm %s3073_s30, 256 }
 0x69a   : > { %p2389_p10 = scmp.ne.s32.totalorder %s2991_s0, %s2388_s1  ;;  %p2393_p6 = scmp.lt.u32.totalorder %s2991_s0, %s3073_s30 }
 0x69b   : > { %p2394_p7 = scmp.lt.u32.totalorder %s2392_s25, %s2388_s1  ;;  %p2396_p12 = scmp.lt.u32.totalorder %s2388_s1, %s2991_s0 }
 0x69c   : > { %p2390_p11 = pnand %p2389_p10, %p3071_p5 }
 0x69d   : > { %p2395_p9 = por %p2394_p7, %p2393_p6 }
 0x69e   : > { %p2391_p1 = pneg %p2390_p11 }
 0x69f   : > { %p2397_p3 = por %p2396_p12, %p2395_p9 }
 0x6a1   : > { %p2398_p13 = pnand %p2397_p3, %p2391_p1 }
 0x6a3   : > { %2401 = shalt.err (!%p2398_p13)
}
 0x6a4   : > { %2094 = dma.vmem_to_hbm [thread:$0]  (%p3071_p5), %s2993_s23, 128, %s2991_s0, %s1742_s21  }
 0x6a5 PF: > { %s1785_s22 = sand.u32 1, %s2440_s13   ;;  %p3074_p0 = scmp.ne.s32.totalorder %s3063_s12, 0 }
 0x6a6   : > { %p3075_p2 = scmp.ge.s32.totalorder %s2452_s16, 2  ;;  %s1786_s17 = scalar_lea.sflag [#allocation4], %s1785_s22 }
 0x6a8   : > { %p2116_p8 = pnand %p3075_p2, %p3074_p0 }
 0x6aa   : > { %2431 = dma.done.wait (!%p2116_p8), %s1786_s17, 128  }
 0x6ab   : > { %2433 = vsyncadd (!%p2116_p8), %s1786_s17, 4294967168  ;;  %s1795_s9 = scalar_lea.sflag [#allocation13], %s1785_s22 }
 0x6ac   : > { %2435 = dma.done.wait (!%p2116_p8), %s1795_s9, 128  }
 0x6ad   : > { %2437 = vsyncadd (!%p2116_p8), %s1795_s9, 4294967168  ;;  %p29_p5 = scmp.ge.s32.totalorder %s2680_s11, 4   ;;  %s3076_s13 = smov %s2444_s14 }
 0x6ae   : > { %s3077_s14 = smov %s2448_s15  ;;  %s3078_s15 = smov %s2691_s29 }
 0x6af   : > { %s3079_s16 = smov %s2680_s11  ;;  %31 = sbr.rel (!%p29_p5) target bundleno = 14 (0xe), region = 134 }
 0x6b6   :  { %1800 = vsyncpa [#allocation3], 1 }
 0x6b7   :  { %1802 = vsyncpa [#allocation3 + $0x1], 1 }
 0x6b8   :  { %1803 = vsyncpa [#allocation6], 1 }
 0x6b9   :  { %1804 = vsyncpa [#allocation9], 1 }
 0x6ba   :  { %1805 = vsyncpa [#allocation4], 1 }
 0x6bb   :  { %1807 = vsyncpa [#allocation4 + $0x1], 1 }
 0x6bc   :  { %1808 = vsyncpa [#allocation13], 1 }
 0x6bd   :  { %1810 = vsyncpa [#allocation13 + $0x1], 1 }

</bundles_post_ra>
